<compile_context>
chip_gen: v7x
topology: tpu7x:2x2x1
jax: 0.10.0
libtpu: 0.0.40
codegen_flags: <defaults>
</compile_context>

<pallas_src>
import functools

import jax
import jax.numpy as jnp
import numpy as np
from jax.experimental import pallas as pl
from jax.experimental.pallas import tpu as pltpu


def _cln_kernel(tid_ref, x_ref, gb_ref, o_ref, *, eps, inv_f):
    # x_ref : (1, TS, F) tile of the current batch element
    # gb_ref: (1, 2, F) -> row 0 = gamma, row 1 = beta of the selected task
    x = x_ref[...].astype(jnp.float32)                     # (1, TS, F)

    # Single pass over the tile: sum and sum-of-squares.
    s1 = jnp.sum(x, axis=-1, keepdims=True)                # (1, TS, 1)
    s2 = jnp.sum(x * x, axis=-1, keepdims=True)            # (1, TS, 1)
    mean = s1 * inv_f
    var = jnp.maximum(s2 * inv_f - mean * mean, 0.0)       # biased var (torch)
    inv_std = jax.lax.rsqrt(var + eps)                     # EUP slot

    # Keep (1, 1, F) views -> pure VPU broadcast multiply-add, no relayout.
    gamma = gb_ref[:, 0:1, :].astype(jnp.float32)          # (1, 1, F)
    beta = gb_ref[:, 1:2, :].astype(jnp.float32)           # (1, 1, F)

    out = gamma * ((x - mean) * inv_std) + beta
    o_ref[...] = out.astype(o_ref.dtype)


def _choose_ts(seq_len, f, itemsize, tile_budget_bytes=2 * 1024 * 1024):
    """Pick a sequence-tile length: ~2 MiB per (TS, F) tile so that
    2 buffers x (input + output) stays ~8 MiB -- inside scoped VMEM even on
    v7x (64 MiB physical / 32 MiB scoped default) with f32 intermediates."""
    rows = tile_budget_bytes // max(1, f * itemsize)
    if rows >= seq_len:
        return seq_len                       # one tile covers the whole sequence
    mult = 8 if itemsize >= 4 else 32 // itemsize   # sublane packing (bf16 -> 16)
    return max(mult, (rows // mult) * mult)


def conditional_layer_norm(x, task_id, embed_weight, *, eps=1e-5):
    """x: (B, S, F); task_id: (B,) int; embed_weight: (num_tasks, 2*F)."""
    B, S, F = x.shape
    num_tasks = embed_weight.shape[0]
    assert embed_weight.shape[1] == 2 * F
    task_id = task_id.astype(jnp.int32)

    # torch .chunk(2, -1): first half = gamma, second half = beta.
    gb = embed_weight.reshape(num_tasks, 2, F)

    itemsize = jnp.dtype(x.dtype).itemsize
    TS = _choose_ts(S, F, itemsize)
    S_pad = -(-S // TS) * TS
    pad_s = S_pad - S

    x_p = x
    if pad_s:
        # Padded rows are zeros; their (harmless) outputs are sliced off below.
        x_p = jnp.pad(x, ((0, 0), (0, pad_s), (0, 0)))

    kernel = functools.partial(_cln_kernel, eps=eps, inv_f=1.0 / F)
    n_s = S_pad // TS

    grid_spec = pltpu.PrefetchScalarGridSpec(
        num_scalar_prefetch=1,
        grid=(B, n_s),  # B outer, S-tiles inner: gamma/beta block stays resident
        in_specs=[
            pl.BlockSpec((1, TS, F), lambda b, s, tid: (b, s, 0)),
            pl.BlockSpec((1, 2, F), lambda b, s, tid: (tid[b], 0, 0)),
        ],
        out_specs=pl.BlockSpec((1, TS, F), lambda b, s, tid: (b, s, 0)),
    )

    out = pl.pallas_call(
        kernel,
        out_shape=jax.ShapeDtypeStruct((B, S_pad, F), x.dtype),
        grid_spec=grid_spec,
        compiler_params=pltpu.CompilerParams(
            dimension_semantics=("parallel", "parallel"),
            vmem_limit_bytes=32 * 1024 * 1024,
        ),
    )(task_id, x_p, gb)

    if pad_s:
        out = out[:, :S, :]
    return out


def _reference(x, task_id, embed_weight, eps=1e-5):
    F = x.shape[-1]
    mean = jnp.mean(x, axis=-1, keepdims=True)
    var = jnp.mean((x - mean) ** 2, axis=-1, keepdims=True)
    norm = (x - mean) / jnp.sqrt(var + eps)
    gb = embed_weight[task_id]                 # (B, 2F)
    gamma, beta = gb[:, :F], gb[:, F:]
    return gamma[:, None, :] * norm + beta[:, None, :]


if __name__ == "__main__":
    NUM_TASKS = 3

    # Main case: lane-dense features (F multiple of 128).
    B, S, F = 2, 16, 128
    key = jax.random.PRNGKey(0)
    kx, kg = jax.random.split(key)
    x = jax.random.normal(kx, (B, S, F), dtype=jnp.float32)
    task_id = jnp.array([0, 2], dtype=jnp.int32)
    # Embedding init matching the module: gamma ~ N(1, 0.02), beta = 0.
    gamma_init = 1.0 + 0.02 * jax.random.normal(kg, (NUM_TASKS, F), dtype=jnp.float32)
    beta_init = jnp.zeros((NUM_TASKS, F), dtype=jnp.float32)
    embed_weight = jnp.concatenate([gamma_init, beta_init], axis=1)   # (NUM_TASKS, 2F)

    out = jax.block_until_ready(conditional_layer_norm(x, task_id, embed_weight))
    ref = _reference(x, task_id, embed_weight)
    np.testing.assert_allclose(np.asarray(out), np.asarray(ref), rtol=1e-5, atol=2e-5)

    # Second case: small, non-128-aligned feature dim (exercises masked lanes).
    B2, S2, F2 = 2, 8, 32
    x2 = jax.random.normal(jax.random.PRNGKey(1), (B2, S2, F2), dtype=jnp.float32)
    tid2 = jnp.array([1, 0], dtype=jnp.int32)
    g2 = 1.0 + 0.02 * jax.random.normal(jax.random.PRNGKey(2), (NUM_TASKS, F2), dtype=jnp.float32)
    ew2 = jnp.concatenate([g2, jnp.zeros((NUM_TASKS, F2), jnp.float32)], axis=1)
    out2 = jax.block_until_ready(conditional_layer_norm(x2, tid2, ew2))
    ref2 = _reference(x2, tid2, ew2)
    np.testing.assert_allclose(np.asarray(out2), np.asarray(ref2), rtol=1e-5, atol=2e-5)

    print("KERNEL_OK")
</pallas_src>

<mosaic_0001>
module attributes {stable_mosaic.version = 11 : i64} {
  func.func @_cln_kernel(%arg0: i32, %arg1: i32, %arg2: memref<2xi32, #tpu.memory_space<smem>>, %arg3: memref<1x16x128xf32, #tpu.memory_space<vmem>>, %arg4: memref<1x2x128xf32, #tpu.memory_space<vmem>>, %arg5: memref<1x16x128xf32, #tpu.memory_space<vmem>>) attributes {dimension_semantics = [#tpu.dimension_semantics<parallel>, #tpu.dimension_semantics<parallel>], iteration_bounds = array<i64: 2, 1>, scalar_prefetch = 1 : i64, scratch_operands = 0 : i64, tpu.core_type = #tpu.core_type<tc>, window_params = [{transform_indices = @transform_0, window_bounds = array<i64: 1, 16, 128>}, {transform_indices = @transform_1, window_bounds = array<i64: 1, 2, 128>}, {transform_indices = @transform_2, window_bounds = array<i64: 1, 16, 128>}]} {
    %c0 = arith.constant 0 : index
    %c0_0 = arith.constant 0 : index
    %c0_1 = arith.constant 0 : index
    %0 = vector.load %arg3[%c0, %c0_0, %c0_1] : memref<1x16x128xf32, #tpu.memory_space<vmem>>, vector<1x16x128xf32>
    %cst = arith.constant dense<0.000000e+00> : vector<1x16xf32>
    %1 = vector.multi_reduction <add>, %0, %cst [2] : vector<1x16x128xf32> to vector<1x16xf32>
    %2 = vector.shape_cast %1 : vector<1x16xf32> to vector<1x16x1xf32>
    %3 = arith.mulf %0, %0 : vector<1x16x128xf32>
    %cst_2 = arith.constant dense<0.000000e+00> : vector<1x16xf32>
    %4 = vector.multi_reduction <add>, %3, %cst_2 [2] : vector<1x16x128xf32> to vector<1x16xf32>
    %5 = vector.shape_cast %4 : vector<1x16xf32> to vector<1x16x1xf32>
    %cst_3 = arith.constant 7.812500e-03 : f32
    %6 = vector.broadcast %cst_3 : f32 to vector<1x16x1xf32>
    %7 = arith.mulf %2, %6 : vector<1x16x1xf32>
    %cst_4 = arith.constant 7.812500e-03 : f32
    %8 = vector.broadcast %cst_4 : f32 to vector<1x16x1xf32>
    %9 = arith.mulf %5, %8 : vector<1x16x1xf32>
    %10 = arith.mulf %7, %7 : vector<1x16x1xf32>
    %11 = arith.subf %9, %10 : vector<1x16x1xf32>
    %cst_5 = arith.constant 0.000000e+00 : f32
    %12 = vector.broadcast %cst_5 : f32 to vector<1x16x1xf32>
    %13 = arith.maximumf %11, %12 : vector<1x16x1xf32>
    %cst_6 = arith.constant 9.99999974E-6 : f32
    %14 = vector.broadcast %cst_6 : f32 to vector<1x16x1xf32>
    %15 = arith.addf %13, %14 : vector<1x16x1xf32>
    %16 = math.rsqrt %15 : vector<1x16x1xf32>
    %c0_7 = arith.constant 0 : index
    %c0_8 = arith.constant 0 : index
    %c0_9 = arith.constant 0 : index
    %17 = vector.load %arg4[%c0_7, %c0_8, %c0_9] : memref<1x2x128xf32, #tpu.memory_space<vmem>>, vector<1x1x128xf32>
    %c0_10 = arith.constant 0 : index
    %c1 = arith.constant 1 : index
    %c0_11 = arith.constant 0 : index
    %18 = vector.load %arg4[%c0_10, %c1, %c0_11] : memref<1x2x128xf32, #tpu.memory_space<vmem>>, vector<1x1x128xf32>
    %19 = vector.broadcast %7 : vector<1x16x1xf32> to vector<1x16x128xf32>
    %20 = arith.subf %0, %19 : vector<1x16x128xf32>
    %21 = vector.broadcast %16 : vector<1x16x1xf32> to vector<1x16x128xf32>
    %22 = arith.mulf %20, %21 : vector<1x16x128xf32>
    %23 = vector.broadcast %17 : vector<1x1x128xf32> to vector<1x16x128xf32>
    %24 = arith.mulf %23, %22 : vector<1x16x128xf32>
    %25 = vector.broadcast %18 : vector<1x1x128xf32> to vector<1x16x128xf32>
    %26 = arith.addf %24, %25 : vector<1x16x128xf32>
    %c0_12 = arith.constant 0 : index
    %c0_13 = arith.constant 0 : index
    %c0_14 = arith.constant 0 : index
    %27 = vector.load %arg5[%c0_12, %c0_13, %c0_14] : memref<1x16x128xf32, #tpu.memory_space<vmem>>, vector<1x16x128xf32>
    tpu.vector_store %arg5[%c0_12, %c0_13, %c0_14], %26 {strides = array<i32>} : memref<1x16x128xf32, #tpu.memory_space<vmem>>, vector<1x16x128xf32>,
    return
  }
  func.func @transform_0(%arg0: i32, %arg1: i32, %arg2: memref<2xi32, #tpu.memory_space<smem>>) -> (i32, i32, i32) {
    %c0_i32 = arith.constant 0 : i32
    %c0_i32_0 = arith.constant 0 : i32
    return %arg0, %arg1, %c0_i32 : i32, i32, i32
  }
  func.func @transform_1(%arg0: i32, %arg1: i32, %arg2: memref<2xi32, #tpu.memory_space<smem>>) -> (i32, i32, i32) {
    %0 = arith.index_cast %arg0 : i32 to index
    %1 = memref.load %arg2[%0] : memref<2xi32, #tpu.memory_space<smem>>
    %c0_i32 = arith.constant 0 : i32
    %c0_i32_0 = arith.constant 0 : i32
    %c0_i32_1 = arith.constant 0 : i32
    return %1, %c0_i32, %c0_i32_0 : i32, i32, i32
  }
  func.func @transform_2(%arg0: i32, %arg1: i32, %arg2: memref<2xi32, #tpu.memory_space<smem>>) -> (i32, i32, i32) {
    %c0_i32 = arith.constant 0 : i32
    %c0_i32_0 = arith.constant 0 : i32
    return %arg0, %arg1, %c0_i32 : i32, i32, i32
  }
}

</mosaic_0001>

<bundles_post_ra>
// kernel: tpu_custom_call.1
= control target key start
LH: loop header
LB: loop body
LE: loop exit
PB: predicated region body
PF: predicated region fallthrough
CT: control target
= control target key end

     0   :  { %s811_s0 = inlined_call_operand.hbm [shape: s32[2], index: 0, kind: input, shape index: {}]   ;;  %s812_s1 = inlined_call_operand.hbm [shape: f32[2,16,128], index: 1, kind: input, shape index: {}]   ;;  %s813_s2 = inlined_call_operand.vmem [shape: f32[3,2,128], index: 2, kind: input, shape index: {}]   ;;  %s814_s3 = inlined_call_operand.hbm [shape: f32[2,16,128], index: 3, kind: output, shape index: {}]  }
   0x1   :  { %s463_s14 = scalar_lea.hbm %s811_s0, 16 }
   0x2   :  { %p464_p0 = scmp.ne.s32.totalorder %s811_s0, %s463_s14  ;;  %p467_p1 = scmp.lt.u32.totalorder %s463_s14, %s811_s0 }
   0x4   :  { %p469_p2 = pnand %p467_p1, %p464_p0 }
   0x6   :  { %472 = shalt.err (!%p469_p2)  }
   0x7   :  { %s589_s19 = smov [#allocation3]  }
   0x8   :  { %9 = dma.hbm_to_smem %s811_s0, 16, %s589_s19, [#allocation2] }
   0x9   :  { %555 = dma.done.wait [#allocation2], 16 }
   0xa   :  { %556 = vsyncadd [#allocation2], 4294967280 }
   0xb   :  { %11 = sfence }
   0xc   :  { %12 = vsyncpa [#allocation5], 0 }
   0xd   :  { %14 = vsyncpa [#allocation5 + $0x1], 0 }
   0xe   :  { %15 = vsyncpa [#allocation6], 0 }
   0xf   :  { %17 = vsyncpa [#allocation6 + $0x1], 0  ;;  %s628_s22 = smov 0   ;;  %s630_s23 = smov 0  }
  0x10   :  { %s632_s24 = smov 0   ;;  %s634_s25 = smov 0  }
  0x11   :  { %s636_s26 = smov 0   ;;  %s638_s27 = smov 0  }
  0x12 LB: > { %s372_s0 = sadd.s32 4294967295, %s587_s27   ;;  %s373_s28 = sadd.s32 4294967294, %s587_s27   ;;  %s587_s27 = sphi %s638_s27, %s23_s27   ;;  %s583_s26 = sphi %s636_s26, %s829_s26   ;;  %s579_s25 = sphi %s634_s25, %s828_s25   ;;  %s575_s24 = sphi %s632_s24, %s827_s24   ;;  %s571_s23 = sphi %s630_s23, %s826_s23   ;;  %s567_s22 = sphi %s628_s22, %s825_s22  }
  0x13   : > { %s35_s29 = sadd.s32 1, %s583_s26  ;;  %s44_s30 = sadd.s32 1, %s575_s24 }
  0x14   : > { %p37_p3 = scmp.ge.s32.totalorder %s35_s29, 2  ;;  %p51_p4 = scmp.ne.s32.totalorder %s575_s24, %s571_s23 }
  0x15   : > { %p52_p5 = scmp.eq.s32.totalorder %s587_s27, 0  ;;  %p57_p6 = scmp.ne.s32.totalorder %s571_s23, %s567_s22 }
  0x16   : > { %s831_s29 = smov (%p37_p3, %s35_s29), 0  ;;  %p58_p8 = scmp.eq.s32.totalorder %s372_s0, 0 }
  0x17   : > { %p669_p7 = por %p52_p5, %p51_p4  ;;  %s39_s5 = ssub.s32 %s583_s26, %s831_s29 }
  0x18   : > { %p111_p9 = scmp.eq.s32.totalorder %s372_s0, 1  ;;  %p42_p10 = scmp.eq.s32.totalorder %s39_s5, 0 }
  0x19   : > { %p675_p11 = por %p58_p8, %p57_p6  ;;  %p117_p13 = scmp.eq.s32.totalorder %s373_s28, 1 }
  0x1a   : > { %p679_p12 = por %p111_p9, %p51_p4  ;;  %p404_p2 = scmp.lt.s32.totalorder %s587_s27, 2 }
  0x1b   : > { %s684_s8 = scalar_select %p42_p10, %s575_s24, %s44_s30  }
  0x1c   : > { %s818_s7 = scalar_select %p679_p12, 1, 0 }
  0x1d   : > { %p686_p0 = por %p117_p13, %p57_p6  ;;  %s137_s10 = sand.u32 1, %s575_s24  }
  0x1e   : > { %s376_s11 = sshll.u32 %s137_s10, 4  ;;  %s390_s12 = sshll.u32 %s583_s26, 8 }
  0x1f   : > { %s819_s9 = scalar_select %p686_p0, 1, 0 }
  0x20   : > { %s697_s15 = scalar_lea.hbm %s812_s1, %s390_s12  ;;  %s141_s16 = scalar_lea.vmem [#allocation4], %s376_s11 }
  0x21   : > { %s150_s17 = sshll.u32 %s141_s16, 4  ;;  %p703_p3 = pnand %p404_p2, %p669_p7  ;;  %s699_s17 = int_to_ptr.vmem [resolvable:$true] %s150_s17 }
  0x22   : > { %s708_s19 = scalar_lea.sflag [#allocation5], %s137_s10  ;;  %s473_s20 = scalar_lea.hbm %s697_s15, 256 }
  0x23   : > { %p474_p5 = scmp.ne.s32.totalorder %s697_s15, %s473_s20  ;;  %p475_p6 = pneg %p703_p3 }
  0x24   : > { %s478_s28 = scalar_lea.hbm %s812_s1, 512  ;;  %p479_p7 = scmp.lt.u32.totalorder %s697_s15, %s812_s1 }
  0x25   : > { %p476_p8 = pnand %p475_p6, %p474_p5  ;;  %p480_p10 = scmp.lt.u32.totalorder %s478_s28, %s473_s20 }
  0x26   : > { %p482_p2 = scmp.lt.u32.totalorder %s473_s20, %s697_s15 }
  0x27   : > { %p477_p9 = pneg %p476_p8  ;;  %p481_p13 = por %p480_p10, %p479_p7 }
  0x29   : > { %p483_p1 = por %p482_p2, %p481_p13 }
  0x2b   : > { %p484_p4 = pnand %p483_p1, %p477_p9 }
  0x2d   : > { %487 = shalt.err (!%p484_p4)
}
  0x2e   : > { %s488_s5 = scalar_lea.vmem %s699_s17, 256  ;;  %s590_s10 = smov [#allocation4]  }
  0x2f   : > { %p489_p5 = scmp.ne.s32.totalorder %s699_s17, %s488_s5  ;;  %s493_s11 = sshll.u32 %s590_s10, 4  ;;  %s494_s11 = int_to_ptr.vmem [resolvable:$false] %s493_s11 }
  0x30   : > { %s495_s12 = scalar_lea.vmem %s494_s11, 512  ;;  %p496_p12 = scmp.lt.s32.totalorder %s699_s17, %s494_s11 }
  0x31   : > { %p491_p8 = pnand %p489_p5, %p475_p6  ;;  %p497_p7 = scmp.lt.s32.totalorder %s495_s12, %s488_s5 }
  0x33   : > { %p492_p0 = pneg %p491_p8  ;;  %p498_p10 = por %p497_p7, %p496_p12 }
  0x35   : > { %p499_p13 = pnand %p498_p10, %p492_p0 }
  0x37   : > { %502 = shalt.err (!%p499_p13)
}
  0x38   : > { %s591_s13 = smov 128   ;;  %s592_s14 = smov 8  }
  0x39   : > { %399 = dma.hbm_to_vmem [thread:$0]  (!%p703_p3), %s697_s15, 256, %s699_s17, %s708_s19, %s591_s13, %s591_s13, %s592_s14  }
  0x3a   : > { %p167_p1 = scmp.lt.s32.totalorder %s587_s27, 3  ;;  %p821_p4 = scmp.ge.s32.totalorder %s587_s27, 1 }
  0x3c   : > { %p168_p6 = pnand %p821_p4, %p167_p1 }
  0x3d   : > { %s740_s16 = sand.u32 (!%p168_p6), 1, %s571_s23  }
  0x3e   : > { %171 = sbr.rel (%p168_p6) target bundleno = 259 (0x103), region = 28  ;;  %s380_s20 = sshll.u32 (!%p168_p6), %s740_s16, 4 }
  0x3f   : > { %s174_s21 = scalar_lea.sflag (!%p168_p6), [#allocation5], %s740_s16  ;;  %s177_s0 = scalar_lea.vmem (!%p168_p6), [#allocation4], %s380_s20 }
  0x45   : > { %558 = dma.done.wait (%p675_p11), %s174_s21, 256  }
  0x46   : > { %560 = vsyncadd (%p675_p11), %s174_s21, 4294967040  ;;  %v211_v0 = vld [vmem:[%s177_s0] sm:$0xff]  ;;  %v212_v1 = vld [vmem:[%s177_s0 + $0x8] sm:$0xff]  ;;  %s204_s15 = sld [smem:[#allocation3 + %s579_s25]]  ;;  %s391_s28 = sshll.u32 %s579_s25, 8 }
  0x47   : > { %213 = vadd.xlane.f32.xlu0 %v211_v0  ;;  %v217_v2 = vmul.f32 %v211_v0, %v211_v0  ;;  %v218_v3 = vmul.f32 %v212_v1, %v212_v1  ;;  %s202_s30 = scalar_lea.vmem [#allocation7], %s380_s20  ;;  %s760_s11 = scalar_lea.hbm %s814_s3, %s391_s28 }
  0x48   : > { %s273_s4 = sshll.u32 %s202_s30, 4  ;;  %s258_s12 = scalar_lea.sflag [#allocation6], %s740_s16  ;;  %s762_s4 = int_to_ptr.vmem [resolvable:$true] %s273_s4 }
  0x49   : > { %219 = vadd.xlane.f32.xlu1 %v217_v2  ;;  %s503_s13 = scalar_lea.vmem %s762_s4, 256  ;;  %p822_p0 = scmp.ne.s32.totalorder %s818_s7, 0 }
  0x4a   : > { %p504_p12 = scmp.ne.s32.totalorder %s762_s4, %s503_s13  ;;  %s593_s25 = smov [#allocation7]  }
  0x4b   : > { %215 = vadd.xlane.f32.xlu0 %v212_v1  ;;  %s507_s14 = sshll.u32 %s593_s25, 4  ;;  %s508_s14 = int_to_ptr.vmem [resolvable:$false] %s507_s14 }
  0x4c   : > { %p205_p11 = scmp.lt.s32.totalorder %s204_s15, 2  ;;  %p505_p3 = pnand %p504_p12, %p822_p0 }
  0x4d   : > { %221 = vadd.xlane.f32.xlu1 %v218_v3  ;;  %s509_s20 = scalar_lea.vmem %s508_s14, 512  ;;  %p510_p2 = scmp.lt.s32.totalorder %s762_s4, %s508_s14 }
  0x4e   : > { %s833_s15 = smov (!%p205_p11, %s204_s15), 2  ;;  %p506_p9 = pneg %p505_p3 }
  0x4f   : > { %s382_s6 = sshll.u32 %s833_s15, 1  ;;  %p511_p5 = scmp.lt.s32.totalorder %s509_s20, %s503_s13 }
  0x50   : > { %s208_s19 = scalar_lea.vmem %s813_s2, %s382_s6 }
  0x51   : > { %v383_v22 = vld [vmem:[%s208_s19] ss:$0 sm:$0xff]  ;;  %v384_v24 = vld [vmem:[%s208_s19 + $0x1] ss:$0 sm:$0xff]  ;;  %p512_p8 = por %p511_p5, %p510_p2 }
  0x53   : > { %p513_p7 = pnand %p512_p8, %p506_p9 }
  0xd4   : > { %v214_v4 = vpop.xlane.xlu0 %213 }
  0xd5   : > { %v223_v5 = vmul.f32 0.0078125, %v214_v4 }
  0xd6   : > { %v220_v6 = vpop.xlane.xlu1 %219 }
  0xd7   : > { %v227_v7 = vmul.f32 %v223_v5, %v223_v5  ;;  %v225_v8 = vmul.f32 0.0078125, %v220_v6  ;;  %v239_v20 = vsub.f32 %v211_v0, %v223_v5 }
  0xd8   : > { %v216_v9 = vpop.xlane.xlu0 %215 }
  0xd9   : > { %v229_v10 = vsub.f32 %v225_v8, %v227_v7  ;;  %v224_v11 = vmul.f32 0.0078125, %v216_v9 }
  0xda   : > { %v222_v12 = vpop.xlane.xlu1 %221 }
  0xdb   : > { %v231_v13 = vmax.f32 %v229_v10, 0.0  ;;  %v228_v14 = vmul.f32 %v224_v11, %v224_v11  ;;  %v226_v15 = vmul.f32 0.0078125, %v222_v12  ;;  %v240_v26 = vsub.f32 %v212_v1, %v224_v11 }
  0xdd   : > { %v233_v16 = vadd.f32 1e-05, %v231_v13  ;;  %v230_v17 = vsub.f32 %v226_v15, %v228_v14 }
  0xdf   : > { %459 = vrsqrt.f32 %v233_v16  ;;  %v232_v18 = vmax.f32 %v230_v17, 0.0 }
  0xe1   : > { %v234_v19 = vadd.f32 1e-05, %v232_v18 }
  0xe3   : > { %461 = vrsqrt.f32 %v234_v19 }
  0xe9   : > { %v460_v21 = vpop.eup %459 }
  0xea   : > { %v241_v23 = vmul.f32 %v460_v21, %v239_v20 }
  0xec   : > { %v247_v25 = vmul.f32 %v383_v22, %v241_v23 }
  0xed   : > { %v462_v27 = vpop.eup %461 }
  0xee   : > { %v253_v28 = vadd.f32 %v384_v24, %v247_v25  ;;  %v242_v29 = vmul.f32 %v462_v27, %v240_v26 }
  0xf0   : > { %v248_v30 = vmul.f32 %v383_v22, %v242_v29  ;;  %255 = vst [vmem:[%s202_s30] sm:$0xff] %v253_v28 }
  0xf2   : > { %v254_v31 = vadd.f32 %v384_v24, %v248_v30 }
  0xf4   : > { %256 = vst [vmem:[%s202_s30 + $0x8] sm:$0xff] %v254_v31 }
  0xf5   : > { %516 = shalt.err (!%p513_p7)
}
  0xf6   : > { %s517_s21 = scalar_lea.hbm %s760_s11, 256  ;;  %s521_s6 = scalar_lea.hbm %s814_s3, 512 }
  0xf7   : > { %p518_p10 = scmp.ne.s32.totalorder %s760_s11, %s517_s21  ;;  %p522_p4 = scmp.lt.u32.totalorder %s760_s11, %s814_s3 }
  0xf8   : > { %p523_p6 = scmp.lt.u32.totalorder %s521_s6, %s517_s21  ;;  %p525_p12 = scmp.lt.u32.totalorder %s517_s21, %s760_s11 }
  0xf9   : > { %p519_p13 = pnand %p518_p10, %p822_p0 }
  0xfa   : > { %p524_p11 = por %p523_p6, %p522_p4 }
  0xfb   : > { %p520_p1 = pneg %p519_p13 }
  0xfc   : > { %p526_p3 = por %p525_p12, %p524_p11 }
  0xfe   : > { %p527_p9 = pnand %p526_p3, %p520_p1 }
 0x100   : > { %530 = shalt.err (!%p527_p9)
}
 0x101   : > { %s594_s19 = smov 128   ;;  %s595_s28 = smov 8  }
 0x102   : > { %394 = dma.vmem_to_hbm [thread:$0]  (%p822_p0), %s762_s4, 256, %s760_s11, %s258_s12, %s594_s19, %s594_s19, %s595_s28  }
 0x103 PF: > { %s288_s30 = sand.u32 1, %s567_s22   ;;  %p823_p2 = scmp.ne.s32.totalorder %s819_s9, 0 }
 0x104   : > { %p824_p5 = scmp.ge.s32.totalorder %s587_s27, 2  ;;  %s289_s5 = scalar_lea.sflag [#allocation6], %s288_s30 }
 0x106   : > { %p401_p8 = pnand %p824_p5, %p823_p2 }
 0x108   : > { %562 = dma.done.wait (!%p401_p8), %s289_s5, 256  }
 0x109   : > { %564 = vsyncadd (!%p401_p8), %s289_s5, 4294967040  ;;  %s23_s27 = sadd.s32 1, %s587_s27   ;;  %s825_s22 = smov %s571_s23 }
 0x10a   : > { %p20_p7 = scmp.ge.s32.totalorder %s23_s27, 4   ;;  %s826_s23 = smov %s575_s24 }
 0x10b   : > { %s827_s24 = smov %s684_s8  ;;  %s828_s25 = smov %s583_s26 }
 0x10c   : > { %s829_s26 = smov %s831_s29  ;;  %22 = sbr.rel (!%p20_p7) target bundleno = 18 (0x12), region = 76 }
 0x113   :  { %294 = vsyncpa [#allocation5], 1 }
 0x114   :  { %296 = vsyncpa [#allocation5 + $0x1], 1 }
 0x115   :  { %297 = vsyncpa [#allocation6], 1 }
 0x116   :  { %299 = vsyncpa [#allocation6 + $0x1], 1 }

</bundles_post_ra>
